<compile_context>
chip_gen: v5e
topology: v5e:2x2
jax: 0.10.0
libtpu: 0.0.40
codegen_flags: <defaults>
</compile_context>

<pallas_src>
import functools
import math

import jax
import jax.numpy as jnp
from jax import lax
from jax.experimental import pallas as pl
from jax.experimental.pallas import tpu as pltpu


def kernel_size(in_channel):
    k = int((math.log2(in_channel) + 1) // 2)
    return k + 1 if k % 2 == 0 else k


# ---------------------------------------------------------------------------
# Shared epilogue: Conv1d(4->1, kernel k, padding k//2) twice + 2-way softmax.
# ---------------------------------------------------------------------------
def _conv_softmax_epilogue(avg1, mx1, avg2, mx2,
                           w1_ref, b1_ref, w2_ref, b2_ref, out_ref, *, k):
    """avg/max rows are (bt, C) f32; writes out_ref (bt, 2, C)."""
    bt, c = avg1.shape
    pad = k // 2

    # Row order matches torch.cat([t1_avg, t1_max, t2_avg, t2_max], dim=2).
    rows = (avg1, mx1, avg2, mx2)
    if pad > 0:
        z = jnp.zeros((bt, pad), jnp.float32)
        rows = tuple(jnp.concatenate([z, r, z], axis=1) for r in rows)

    # PyTorch cross-correlation; weights read as scalars from SMEM.
    a1 = jnp.zeros((bt, c), jnp.float32) + b1_ref[0]
    a2 = jnp.zeros((bt, c), jnp.float32) + b2_ref[0]
    for j in range(k):                      # k, bt, c are static Python ints
        for i in range(4):
            win = rows[i][:, j:j + c]       # (bt, C)
            a1 = a1 + w1_ref[i, j] * win
            a2 = a2 + w2_ref[i, j] * win

    # Softmax over the 2-stack == sigmoid of the difference (one EUP exp).
    s1 = jax.nn.sigmoid(a1 - a2)
    out_ref[:, 0, :] = s1
    out_ref[:, 1, :] = 1.0 - s1


# ---------------------------------------------------------------------------
# Kernel 1: the whole spatial extent fits in one block.
# ---------------------------------------------------------------------------
def _ca_single_tile_kernel(t1_ref, t2_ref, w1_ref, b1_ref, w2_ref, b2_ref,
                           out_ref, *, k, hw_total):
    inv_hw = jnp.float32(1.0 / hw_total)
    x1 = t1_ref[...].astype(jnp.float32)            # (bt, C, HW)
    x2 = t2_ref[...].astype(jnp.float32)
    avg1 = jnp.sum(x1, axis=-1) * inv_hw
    mx1 = jnp.max(x1, axis=-1)
    avg2 = jnp.sum(x2, axis=-1) * inv_hw
    mx2 = jnp.max(x2, axis=-1)
    _conv_softmax_epilogue(avg1, mx1, avg2, mx2,
                           w1_ref, b1_ref, w2_ref, b2_ref, out_ref, k=k)


# ---------------------------------------------------------------------------
# Kernel 2: HW tiled; lane-resident accumulators, masked last tile only.
# ---------------------------------------------------------------------------
def _ca_tiled_kernel(t1_ref, t2_ref, w1_ref, b1_ref, w2_ref, b2_ref, out_ref,
                     sum1_ref, max1_ref, sum2_ref, max2_ref,
                     *, k, hw_total, tile_hw, needs_mask):
    hw_idx = pl.program_id(1)
    n_hw = pl.num_programs(1)
    g = tile_hw // 128                               # static (tile_hw % 128 == 0)

    @pl.when(hw_idx == 0)
    def _init():
        sum1_ref[...] = jnp.zeros_like(sum1_ref)
        sum2_ref[...] = jnp.zeros_like(sum2_ref)
        max1_ref[...] = jnp.full_like(max1_ref, -jnp.inf)
        max2_ref[...] = jnp.full_like(max2_ref, -jnp.inf)

    def accumulate(masked):
        # Elementwise (VPU-only) accumulation into (bt, C, 128) lane-resident
        # scratch; the cross-lane XLU reduce is deferred to the finalize step.
        s1 = sum1_ref[...]
        m1 = max1_ref[...]
        s2 = sum2_ref[...]
        m2 = max2_ref[...]
        if masked:
            lane = lax.broadcasted_iota(jnp.int32, (1, 1, 128), 2)
            base = hw_idx * tile_hw
        for gi in range(g):
            c1 = t1_ref[:, :, pl.ds(gi * 128, 128)].astype(jnp.float32)
            c2 = t2_ref[:, :, pl.ds(gi * 128, 128)].astype(jnp.float32)
            if masked:
                valid = (base + gi * 128 + lane) < hw_total
                s1 = s1 + jnp.where(valid, c1, 0.0)
                s2 = s2 + jnp.where(valid, c2, 0.0)
                m1 = jnp.maximum(m1, jnp.where(valid, c1, -jnp.inf))
                m2 = jnp.maximum(m2, jnp.where(valid, c2, -jnp.inf))
            else:
                s1 = s1 + c1
                s2 = s2 + c2
                m1 = jnp.maximum(m1, c1)
                m2 = jnp.maximum(m2, c2)
        sum1_ref[...] = s1
        max1_ref[...] = m1
        sum2_ref[...] = s2
        max2_ref[...] = m2

    if needs_mask:
        # The OOB lanes of the final (partial) block are undefined, so the
        # mask is required there -- but only there.
        @pl.when(hw_idx < n_hw - 1)
        def _acc_fast():
            accumulate(masked=False)

        @pl.when(hw_idx == n_hw - 1)
        def _acc_masked():
            accumulate(masked=True)
    else:
        accumulate(masked=False)

    @pl.when(hw_idx == n_hw - 1)
    def _finalize():
        inv_hw = jnp.float32(1.0 / hw_total)
        avg1 = jnp.sum(sum1_ref[...], axis=-1) * inv_hw     # single XLU reduce
        mx1 = jnp.max(max1_ref[...], axis=-1)
        avg2 = jnp.sum(sum2_ref[...], axis=-1) * inv_hw
        mx2 = jnp.max(max2_ref[...], axis=-1)
        _conv_softmax_epilogue(avg1, mx1, avg2, mx2,
                               w1_ref, b1_ref, w2_ref, b2_ref, out_ref, k=k)


# ---------------------------------------------------------------------------
# Tiling heuristics (generation-aware).
# ---------------------------------------------------------------------------
def _vmem_capacity_bytes():
    try:
        info = pltpu.get_tpu_info()
        cap = getattr(info, "vmem_capacity_bytes", None)
        if cap:
            return int(cap)
    except Exception:
        pass
    return 64 << 20       # conservative (v7x-sized) fallback


def _choose_tiling(B, C, HW, itemsize):
    """Pick (tile_hw, bt, vmem_cap)."""
    vmem_cap = _vmem_capacity_bytes()
    target_block_bytes = 4 << 20      # ~4 MiB per (1, C, tile_hw) input block
    amortize_bytes = 2 << 20          # >= ~2 MiB of input per grid step
    input_budget = int(vmem_cap * 0.45)   # 2 inputs x 2 buffers + accumulators

    row_bytes = C * itemsize
    if C * HW * itemsize <= target_block_bytes or HW <= 128:
        tile_hw = HW                                   # full spatial extent
    else:
        t = target_block_bytes // max(1, row_bytes)
        tile_hw = max(128, (t // 128) * 128)           # multiple of 128
        if tile_hw >= HW:
            tile_hw = HW

    multi = tile_hw < HW
    block_unit = C * tile_hw * itemsize                # one (1, C, tile_hw) block
    scratch_unit = (4 * C * 128 * 4) if multi else 0   # per-bt accumulator scratch

    denom = 4 * block_unit + scratch_unit
    bt_cap = max(1, input_budget // max(1, denom))
    bt_target = max(1, -(-amortize_bytes // max(1, block_unit)))
    mega_cap = max(1, B // 2) if B >= 2 else 1         # keep >=2 grid blocks (v7x)
    bt_want = int(min(bt_cap, bt_target, mega_cap, B))
    bt = 1
    for d in range(bt_want, 0, -1):                    # largest divisor of B
        if B % d == 0:
            bt = d
            break
    return int(tile_hw), int(bt), vmem_cap


# ---------------------------------------------------------------------------
# Wrapper.
# ---------------------------------------------------------------------------
def channel_attention(t1, t2, w1, b1, w2, b2, *, tile_hw=None, block_b=None):
    """t1, t2: (B, C, H, W).  w1/w2: (1, 4, k).  b1/b2: (1,).
    Returns (2, B, C, 1, 1), matching the PyTorch module output.
    Feed bf16 t1/t2 where possible: this kernel is HBM-read-bound and upcasts
    to f32 internally."""
    B, C, H, W = t1.shape
    k = w1.shape[-1]
    HW = H * W
    itemsize = jnp.dtype(t1.dtype).itemsize

    t1f = t1.reshape(B, C, HW)                 # keep caller dtype
    t2f = t2.reshape(B, C, HW)
    w1_2d = w1.reshape(4, k).astype(jnp.float32)
    w2_2d = w2.reshape(4, k).astype(jnp.float32)
    b1_1d = b1.reshape(1).astype(jnp.float32)
    b2_1d = b2.reshape(1).astype(jnp.float32)

    auto_tile, auto_bt, vmem_cap = _choose_tiling(B, C, HW, itemsize)
    tile = auto_tile if tile_hw is None else int(tile_hw)
    if tile >= HW:
        tile = HW
    bt = auto_bt if block_b is None else int(block_b)
    assert B % bt == 0, (B, bt)
    assert tile == HW or tile % 128 == 0, tile

    multi = tile < HW
    smem = pl.BlockSpec(memory_space=pltpu.MemorySpace.SMEM)

    # Explicit scoped-VMEM budget: 2 inputs x 2 buffers + accumulator scratch
    # + output + margin, capped at 3/4 of physical (<= ~48 MiB on v7x, well
    # above v5e's 16 MiB default so larger blocks are never silently rejected).
    need = 4 * bt * C * tile * itemsize
    if multi:
        need += 4 * bt * C * 128 * 4
    need += 2 * bt * 2 * C * 4
    vmem_limit = int(max(32 << 20, min(vmem_cap * 3 // 4, need + (16 << 20))))

    if multi:
        n_hw = pl.cdiv(HW, tile)
        needs_mask = (HW % tile) != 0
        kernel = functools.partial(_ca_tiled_kernel, k=k, hw_total=HW,
                                   tile_hw=tile, needs_mask=needs_mask)
        grid = (B // bt, n_hw)
        in_specs = [
            pl.BlockSpec((bt, C, tile), lambda b, h: (b, 0, h)),
            pl.BlockSpec((bt, C, tile), lambda b, h: (b, 0, h)),
            smem, smem, smem, smem,
        ]
        out_specs = pl.BlockSpec((bt, 2, C), lambda b, h: (b, 0, 0))
        scratch = [pltpu.VMEM((bt, C, 128), jnp.float32)] * 4
        dim_sem = ("parallel", "arbitrary")
    else:
        kernel = functools.partial(_ca_single_tile_kernel, k=k, hw_total=HW)
        grid = (B // bt,)
        in_specs = [
            pl.BlockSpec((bt, C, HW), lambda b: (b, 0, 0)),
            pl.BlockSpec((bt, C, HW), lambda b: (b, 0, 0)),
            smem, smem, smem, smem,
        ]
        out_specs = pl.BlockSpec((bt, 2, C), lambda b: (b, 0, 0))
        scratch = []
        dim_sem = ("parallel",)

    out = pl.pallas_call(
        kernel,
        out_shape=jax.ShapeDtypeStruct((B, 2, C), jnp.float32),
        grid_spec=pltpu.PrefetchScalarGridSpec(
            num_scalar_prefetch=0,
            grid=grid,
            in_specs=in_specs,
            out_specs=out_specs,
            scratch_shapes=scratch,
        ),
        compiler_params=pltpu.CompilerParams(
            dimension_semantics=dim_sem,
            vmem_limit_bytes=vmem_limit),
    )(t1f, t2f, w1_2d, b1_1d, w2_2d, b2_1d)

    # (B, 2, C) -> (2, B, C, 1, 1).  Touches only 2*B*C floats (negligible vs
    # the 2*B*C*HW element reads) and keeps the out BlockSpec trivially legal.
    return jnp.transpose(out, (1, 0, 2)).reshape(2, B, C, 1, 1)


# ---------------------------------------------------------------------------
# Pure-JAX reference mirroring the PyTorch forward exactly.
# ---------------------------------------------------------------------------
def channel_attention_reference(t1, t2, w1, b1, w2, b2):
    k = w1.shape[-1]
    pad = k // 2
    t1 = t1.astype(jnp.float32)
    t2 = t2.astype(jnp.float32)
    avg1 = jnp.mean(t1, axis=(2, 3))
    max1 = jnp.max(t1, axis=(2, 3))
    avg2 = jnp.mean(t2, axis=(2, 3))
    max2 = jnp.max(t2, axis=(2, 3))
    pool = jnp.stack([avg1, max1, avg2, max2], axis=1)           # (B, 4, C)

    def conv(w, b):
        y = lax.conv_general_dilated(
            pool, w.astype(jnp.float32), window_strides=(1,),
            padding=[(pad, pad)], dimension_numbers=("NCH", "OIH", "NCH"))
        return y + b.reshape(1, 1, 1)

    a1 = conv(w1, b1)                                            # (B, 1, C)
    a2 = conv(w2, b2)
    st = jax.nn.softmax(jnp.stack([a1, a2], axis=0), axis=0)     # (2, B, 1, C)
    return jnp.swapaxes(st, -1, -2)[..., None]                   # (2, B, C, 1, 1)


if __name__ == "__main__":
    key = jax.random.PRNGKey(0)

    def make_params(pkey, C):
        kk = kernel_size(C)
        k3, k4, k5, k6 = jax.random.split(pkey, 4)
        bound = 1.0 / math.sqrt(4 * kk)
        w1 = jax.random.uniform(k3, (1, 4, kk), jnp.float32, -bound, bound)
        b1 = jax.random.uniform(k4, (1,), jnp.float32, -bound, bound)
        w2 = jax.random.uniform(k5, (1, 4, kk), jnp.float32, -bound, bound)
        b2 = jax.random.uniform(k6, (1,), jnp.float32, -bound, bound)
        return w1, b1, w2, b2

    # --- Test 1: tiny feature map (single-tile kernel, grid split over B) ---
    B, C, H, W = 2, 16, 8, 8
    k1, k2, kp, key = jax.random.split(key, 4)
    t1 = jax.random.normal(k1, (B, C, H, W), jnp.float32)
    t2 = jax.random.normal(k2, (B, C, H, W), jnp.float32)
    w1, b1, w2, b2 = make_params(kp, C)
    out = jax.block_until_ready(channel_attention(t1, t2, w1, b1, w2, b2))
    ref = channel_attention_reference(t1, t2, w1, b1, w2, b2)
    assert out.shape == (2, B, C, 1, 1), out.shape
    assert bool(jnp.allclose(out, ref, atol=1e-5, rtol=1e-5)), "test1 mismatch"

    # --- Test 2: forced HW tiling (lane-resident accumulation + masked last
    #     tile, bt > 1 batch packing) ---
    B, C, H, W = 4, 16, 25, 40          # HW=1000, tile=256 -> 4 tiles, last masked
    k1, k2, kp, key = jax.random.split(key, 4)
    t1 = jax.random.normal(k1, (B, C, H, W), jnp.float32)
    t2 = jax.random.normal(k2, (B, C, H, W), jnp.float32)
    w1, b1, w2, b2 = make_params(kp, C)
    out = jax.block_until_ready(
        channel_attention(t1, t2, w1, b1, w2, b2, tile_hw=256, block_b=2))
    ref = channel_attention_reference(t1, t2, w1, b1, w2, b2)
    assert out.shape == (2, B, C, 1, 1), out.shape
    assert bool(jnp.allclose(out, ref, atol=1e-5, rtol=1e-5)), "test2 mismatch"

    # --- Test 3: bf16 ingest (halved HBM traffic path), auto tiling ---
    B, C, H, W = 4, 16, 16, 16
    k1, k2, kp, key = jax.random.split(key, 4)
    t1 = jax.random.normal(k1, (B, C, H, W), jnp.float32).astype(jnp.bfloat16)
    t2 = jax.random.normal(k2, (B, C, H, W), jnp.float32).astype(jnp.bfloat16)
    w1, b1, w2, b2 = make_params(kp, C)
    out = jax.block_until_ready(channel_attention(t1, t2, w1, b1, w2, b2))
    ref = channel_attention_reference(t1, t2, w1, b1, w2, b2)
    assert out.shape == (2, B, C, 1, 1), out.shape
    assert bool(jnp.allclose(out, ref, atol=2e-3, rtol=2e-3)), "test3 mismatch"

    print("KERNEL_OK")
</pallas_src>

<mosaic_0001>
module attributes {stable_mosaic.version = 11 : i64} {
  func.func @_ca_single_tile_kernel(%arg0: i32, %arg1: memref<1x16x64xf32, #tpu.memory_space<vmem>>, %arg2: memref<1x16x64xf32, #tpu.memory_space<vmem>>, %arg3: memref<4x3xf32, #tpu.memory_space<smem>>, %arg4: memref<1xf32, #tpu.memory_space<smem>>, %arg5: memref<4x3xf32, #tpu.memory_space<smem>>, %arg6: memref<1xf32, #tpu.memory_space<smem>>, %arg7: memref<1x2x16xf32, #tpu.memory_space<vmem>>) attributes {dimension_semantics = [#tpu.dimension_semantics<parallel>], iteration_bounds = array<i64: 2>, scalar_prefetch = 0 : i64, scratch_operands = 0 : i64, tpu.core_type = #tpu.core_type<tc>, window_params = [{transform_indices = @transform_0, window_bounds = array<i64: 1, 16, 64>}, {transform_indices = @transform_1, window_bounds = array<i64: 1, 16, 64>}, {transform_indices = @transform_2, window_bounds = array<i64: 4, 3>}, {transform_indices = @transform_3, window_bounds = array<i64: 1>}, {transform_indices = @transform_4, window_bounds = array<i64: 4, 3>}, {transform_indices = @transform_5, window_bounds = array<i64: 1>}, {transform_indices = @transform_6, window_bounds = array<i64: 1, 2, 16>}]} {
    %c0 = arith.constant 0 : index
    %c0_0 = arith.constant 0 : index
    %c0_1 = arith.constant 0 : index
    %0 = vector.load %arg1[%c0, %c0_0, %c0_1] : memref<1x16x64xf32, #tpu.memory_space<vmem>>, vector<1x16x64xf32>
    %c0_2 = arith.constant 0 : index
    %c0_3 = arith.constant 0 : index
    %c0_4 = arith.constant 0 : index
    %1 = vector.load %arg2[%c0_2, %c0_3, %c0_4] : memref<1x16x64xf32, #tpu.memory_space<vmem>>, vector<1x16x64xf32>
    %cst = arith.constant dense<0.000000e+00> : vector<1x16xf32>
    %2 = vector.multi_reduction <add>, %0, %cst [2] : vector<1x16x64xf32> to vector<1x16xf32>
    %cst_5 = arith.constant 1.562500e-02 : f32
    %3 = vector.broadcast %cst_5 : f32 to vector<1x16xf32>
    %4 = arith.mulf %2, %3 : vector<1x16xf32>
    %cst_6 = arith.constant dense<0xFF800000> : vector<1x16xf32>
    %5 = vector.multi_reduction <maximumf>, %0, %cst_6 [2] : vector<1x16x64xf32> to vector<1x16xf32>
    %cst_7 = arith.constant dense<0.000000e+00> : vector<1x16xf32>
    %6 = vector.multi_reduction <add>, %1, %cst_7 [2] : vector<1x16x64xf32> to vector<1x16xf32>
    %cst_8 = arith.constant 1.562500e-02 : f32
    %7 = vector.broadcast %cst_8 : f32 to vector<1x16xf32>
    %8 = arith.mulf %6, %7 : vector<1x16xf32>
    %cst_9 = arith.constant dense<0xFF800000> : vector<1x16xf32>
    %9 = vector.multi_reduction <maximumf>, %1, %cst_9 [2] : vector<1x16x64xf32> to vector<1x16xf32>
    %cst_10 = arith.constant 0.000000e+00 : f32
    %10 = vector.broadcast %cst_10 : f32 to vector<1x1xf32>
    %11 = tpu.concatenate %10, %4, %10 in 1 : vector<1x1xf32>, vector<1x16xf32>, vector<1x1xf32> -> vector<1x18xf32>
    %12 = tpu.concatenate %10, %5, %10 in 1 : vector<1x1xf32>, vector<1x16xf32>, vector<1x1xf32> -> vector<1x18xf32>
    %13 = tpu.concatenate %10, %8, %10 in 1 : vector<1x1xf32>, vector<1x16xf32>, vector<1x1xf32> -> vector<1x18xf32>
    %14 = tpu.concatenate %10, %9, %10 in 1 : vector<1x1xf32>, vector<1x16xf32>, vector<1x1xf32> -> vector<1x18xf32>
    %cst_11 = arith.constant 0.000000e+00 : f32
    %15 = vector.broadcast %cst_11 : f32 to vector<1x16xf32>
    %c0_12 = arith.constant 0 : index
    %16 = memref.load %arg4[%c0_12] : memref<1xf32, #tpu.memory_space<smem>>
    %17 = vector.broadcast %16 : f32 to vector<1x16xf32>
    %18 = arith.addf %15, %17 : vector<1x16xf32>
    %cst_13 = arith.constant 0.000000e+00 : f32
    %19 = vector.broadcast %cst_13 : f32 to vector<1x16xf32>
    %c0_14 = arith.constant 0 : index
    %20 = memref.load %arg6[%c0_14] : memref<1xf32, #tpu.memory_space<smem>>
    %21 = vector.broadcast %20 : f32 to vector<1x16xf32>
    %22 = arith.addf %19, %21 : vector<1x16xf32>
    %23 = vector.extract_strided_slice %11 {offsets = [0, 0], sizes = [1, 16], strides = [1, 1]} : vector<1x18xf32> to vector<1x16xf32>
    %c0_15 = arith.constant 0 : index
    %c0_16 = arith.constant 0 : index
    %24 = memref.load %arg3[%c0_15, %c0_16] : memref<4x3xf32, #tpu.memory_space<smem>>
    %25 = vector.broadcast %24 : f32 to vector<1x16xf32>
    %26 = arith.mulf %25, %23 : vector<1x16xf32>
    %27 = arith.addf %18, %26 : vector<1x16xf32>
    %c0_17 = arith.constant 0 : index
    %c0_18 = arith.constant 0 : index
    %28 = memref.load %arg5[%c0_17, %c0_18] : memref<4x3xf32, #tpu.memory_space<smem>>
    %29 = vector.broadcast %28 : f32 to vector<1x16xf32>
    %30 = arith.mulf %29, %23 : vector<1x16xf32>
    %31 = arith.addf %22, %30 : vector<1x16xf32>
    %32 = vector.extract_strided_slice %12 {offsets = [0, 0], sizes = [1, 16], strides = [1, 1]} : vector<1x18xf32> to vector<1x16xf32>
    %c1 = arith.constant 1 : index
    %c0_19 = arith.constant 0 : index
    %33 = memref.load %arg3[%c1, %c0_19] : memref<4x3xf32, #tpu.memory_space<smem>>
    %34 = vector.broadcast %33 : f32 to vector<1x16xf32>
    %35 = arith.mulf %34, %32 : vector<1x16xf32>
    %36 = arith.addf %27, %35 : vector<1x16xf32>
    %c1_20 = arith.constant 1 : index
    %c0_21 = arith.constant 0 : index
    %37 = memref.load %arg5[%c1_20, %c0_21] : memref<4x3xf32, #tpu.memory_space<smem>>
    %38 = vector.broadcast %37 : f32 to vector<1x16xf32>
    %39 = arith.mulf %38, %32 : vector<1x16xf32>
    %40 = arith.addf %31, %39 : vector<1x16xf32>
    %41 = vector.extract_strided_slice %13 {offsets = [0, 0], sizes = [1, 16], strides = [1, 1]} : vector<1x18xf32> to vector<1x16xf32>
    %c2 = arith.constant 2 : index
    %c0_22 = arith.constant 0 : index
    %42 = memref.load %arg3[%c2, %c0_22] : memref<4x3xf32, #tpu.memory_space<smem>>
    %43 = vector.broadcast %42 : f32 to vector<1x16xf32>
    %44 = arith.mulf %43, %41 : vector<1x16xf32>
    %45 = arith.addf %36, %44 : vector<1x16xf32>
    %c2_23 = arith.constant 2 : index
    %c0_24 = arith.constant 0 : index
    %46 = memref.load %arg5[%c2_23, %c0_24] : memref<4x3xf32, #tpu.memory_space<smem>>
    %47 = vector.broadcast %46 : f32 to vector<1x16xf32>
    %48 = arith.mulf %47, %41 : vector<1x16xf32>
    %49 = arith.addf %40, %48 : vector<1x16xf32>
    %50 = vector.extract_strided_slice %14 {offsets = [0, 0], sizes = [1, 16], strides = [1, 1]} : vector<1x18xf32> to vector<1x16xf32>
    %c3 = arith.constant 3 : index
    %c0_25 = arith.constant 0 : index
    %51 = memref.load %arg3[%c3, %c0_25] : memref<4x3xf32, #tpu.memory_space<smem>>
    %52 = vector.broadcast %51 : f32 to vector<1x16xf32>
    %53 = arith.mulf %52, %50 : vector<1x16xf32>
    %54 = arith.addf %45, %53 : vector<1x16xf32>
    %c3_26 = arith.constant 3 : index
    %c0_27 = arith.constant 0 : index
    %55 = memref.load %arg5[%c3_26, %c0_27] : memref<4x3xf32, #tpu.memory_space<smem>>
    %56 = vector.broadcast %55 : f32 to vector<1x16xf32>
    %57 = arith.mulf %56, %50 : vector<1x16xf32>
    %58 = arith.addf %49, %57 : vector<1x16xf32>
    %59 = vector.extract_strided_slice %11 {offsets = [0, 1], sizes = [1, 16], strides = [1, 1]} : vector<1x18xf32> to vector<1x16xf32>
    %c0_28 = arith.constant 0 : index
    %c1_29 = arith.constant 1 : index
    %60 = memref.load %arg3[%c0_28, %c1_29] : memref<4x3xf32, #tpu.memory_space<smem>>
    %61 = vector.broadcast %60 : f32 to vector<1x16xf32>
    %62 = arith.mulf %61, %59 : vector<1x16xf32>
    %63 = arith.addf %54, %62 : vector<1x16xf32>
    %c0_30 = arith.constant 0 : index
    %c1_31 = arith.constant 1 : index
    %64 = memref.load %arg5[%c0_30, %c1_31] : memref<4x3xf32, #tpu.memory_space<smem>>
    %65 = vector.broadcast %64 : f32 to vector<1x16xf32>
    %66 = arith.mulf %65, %59 : vector<1x16xf32>
    %67 = arith.addf %58, %66 : vector<1x16xf32>
    %68 = vector.extract_strided_slice %12 {offsets = [0, 1], sizes = [1, 16], strides = [1, 1]} : vector<1x18xf32> to vector<1x16xf32>
    %c1_32 = arith.constant 1 : index
    %c1_33 = arith.constant 1 : index
    %69 = memref.load %arg3[%c1_32, %c1_33] : memref<4x3xf32, #tpu.memory_space<smem>>
    %70 = vector.broadcast %69 : f32 to vector<1x16xf32>
    %71 = arith.mulf %70, %68 : vector<1x16xf32>
    %72 = arith.addf %63, %71 : vector<1x16xf32>
    %c1_34 = arith.constant 1 : index
    %c1_35 = arith.constant 1 : index
    %73 = memref.load %arg5[%c1_34, %c1_35] : memref<4x3xf32, #tpu.memory_space<smem>>
    %74 = vector.broadcast %73 : f32 to vector<1x16xf32>
    %75 = arith.mulf %74, %68 : vector<1x16xf32>
    %76 = arith.addf %67, %75 : vector<1x16xf32>
    %77 = vector.extract_strided_slice %13 {offsets = [0, 1], sizes = [1, 16], strides = [1, 1]} : vector<1x18xf32> to vector<1x16xf32>
    %c2_36 = arith.constant 2 : index
    %c1_37 = arith.constant 1 : index
    %78 = memref.load %arg3[%c2_36, %c1_37] : memref<4x3xf32, #tpu.memory_space<smem>>
    %79 = vector.broadcast %78 : f32 to vector<1x16xf32>
    %80 = arith.mulf %79, %77 : vector<1x16xf32>
    %81 = arith.addf %72, %80 : vector<1x16xf32>
    %c2_38 = arith.constant 2 : index
    %c1_39 = arith.constant 1 : index
    %82 = memref.load %arg5[%c2_38, %c1_39] : memref<4x3xf32, #tpu.memory_space<smem>>
    %83 = vector.broadcast %82 : f32 to vector<1x16xf32>
    %84 = arith.mulf %83, %77 : vector<1x16xf32>
    %85 = arith.addf %76, %84 : vector<1x16xf32>
    %86 = vector.extract_strided_slice %14 {offsets = [0, 1], sizes = [1, 16], strides = [1, 1]} : vector<1x18xf32> to vector<1x16xf32>
    %c3_40 = arith.constant 3 : index
    %c1_41 = arith.constant 1 : index
    %87 = memref.load %arg3[%c3_40, %c1_41] : memref<4x3xf32, #tpu.memory_space<smem>>
    %88 = vector.broadcast %87 : f32 to vector<1x16xf32>
    %89 = arith.mulf %88, %86 : vector<1x16xf32>
    %90 = arith.addf %81, %89 : vector<1x16xf32>
    %c3_42 = arith.constant 3 : index
    %c1_43 = arith.constant 1 : index
    %91 = memref.load %arg5[%c3_42, %c1_43] : memref<4x3xf32, #tpu.memory_space<smem>>
    %92 = vector.broadcast %91 : f32 to vector<1x16xf32>
    %93 = arith.mulf %92, %86 : vector<1x16xf32>
    %94 = arith.addf %85, %93 : vector<1x16xf32>
    %95 = vector.extract_strided_slice %11 {offsets = [0, 2], sizes = [1, 16], strides = [1, 1]} : vector<1x18xf32> to vector<1x16xf32>
    %c0_44 = arith.constant 0 : index
    %c2_45 = arith.constant 2 : index
    %96 = memref.load %arg3[%c0_44, %c2_45] : memref<4x3xf32, #tpu.memory_space<smem>>
    %97 = vector.broadcast %96 : f32 to vector<1x16xf32>
    %98 = arith.mulf %97, %95 : vector<1x16xf32>
    %99 = arith.addf %90, %98 : vector<1x16xf32>
    %c0_46 = arith.constant 0 : index
    %c2_47 = arith.constant 2 : index
    %100 = memref.load %arg5[%c0_46, %c2_47] : memref<4x3xf32, #tpu.memory_space<smem>>
    %101 = vector.broadcast %100 : f32 to vector<1x16xf32>
    %102 = arith.mulf %101, %95 : vector<1x16xf32>
    %103 = arith.addf %94, %102 : vector<1x16xf32>
    %104 = vector.extract_strided_slice %12 {offsets = [0, 2], sizes = [1, 16], strides = [1, 1]} : vector<1x18xf32> to vector<1x16xf32>
    %c1_48 = arith.constant 1 : index
    %c2_49 = arith.constant 2 : index
    %105 = memref.load %arg3[%c1_48, %c2_49] : memref<4x3xf32, #tpu.memory_space<smem>>
    %106 = vector.broadcast %105 : f32 to vector<1x16xf32>
    %107 = arith.mulf %106, %104 : vector<1x16xf32>
    %108 = arith.addf %99, %107 : vector<1x16xf32>
    %c1_50 = arith.constant 1 : index
    %c2_51 = arith.constant 2 : index
    %109 = memref.load %arg5[%c1_50, %c2_51] : memref<4x3xf32, #tpu.memory_space<smem>>
    %110 = vector.broadcast %109 : f32 to vector<1x16xf32>
    %111 = arith.mulf %110, %104 : vector<1x16xf32>
    %112 = arith.addf %103, %111 : vector<1x16xf32>
    %113 = vector.extract_strided_slice %13 {offsets = [0, 2], sizes = [1, 16], strides = [1, 1]} : vector<1x18xf32> to vector<1x16xf32>
    %c2_52 = arith.constant 2 : index
    %c2_53 = arith.constant 2 : index
    %114 = memref.load %arg3[%c2_52, %c2_53] : memref<4x3xf32, #tpu.memory_space<smem>>
    %115 = vector.broadcast %114 : f32 to vector<1x16xf32>
    %116 = arith.mulf %115, %113 : vector<1x16xf32>
    %117 = arith.addf %108, %116 : vector<1x16xf32>
    %c2_54 = arith.constant 2 : index
    %c2_55 = arith.constant 2 : index
    %118 = memref.load %arg5[%c2_54, %c2_55] : memref<4x3xf32, #tpu.memory_space<smem>>
    %119 = vector.broadcast %118 : f32 to vector<1x16xf32>
    %120 = arith.mulf %119, %113 : vector<1x16xf32>
    %121 = arith.addf %112, %120 : vector<1x16xf32>
    %122 = vector.extract_strided_slice %14 {offsets = [0, 2], sizes = [1, 16], strides = [1, 1]} : vector<1x18xf32> to vector<1x16xf32>
    %c3_56 = arith.constant 3 : index
    %c2_57 = arith.constant 2 : index
    %123 = memref.load %arg3[%c3_56, %c2_57] : memref<4x3xf32, #tpu.memory_space<smem>>
    %124 = vector.broadcast %123 : f32 to vector<1x16xf32>
    %125 = arith.mulf %124, %122 : vector<1x16xf32>
    %126 = arith.addf %117, %125 : vector<1x16xf32>
    %c3_58 = arith.constant 3 : index
    %c2_59 = arith.constant 2 : index
    %127 = memref.load %arg5[%c3_58, %c2_59] : memref<4x3xf32, #tpu.memory_space<smem>>
    %128 = vector.broadcast %127 : f32 to vector<1x16xf32>
    %129 = arith.mulf %128, %122 : vector<1x16xf32>
    %130 = arith.addf %121, %129 : vector<1x16xf32>
    %131 = arith.subf %126, %130 : vector<1x16xf32>
    %132 = arith.negf %131 : vector<1x16xf32>
    %133 = math.exp %132 : vector<1x16xf32>
    %cst_60 = arith.constant 1.000000e+00 : f32
    %134 = vector.broadcast %cst_60 : f32 to vector<1x16xf32>
    %135 = arith.addf %134, %133 : vector<1x16xf32>
    %136 = arith.divf %134, %135 : vector<1x16xf32>
    %c0_61 = arith.constant 0 : index
    %c0_62 = arith.constant 0 : index
    %c0_63 = arith.constant 0 : index
    %137 = vector.load %arg7[%c0_61, %c0_62, %c0_63] : memref<1x2x16xf32, #tpu.memory_space<vmem>>, vector<1x1x16xf32>
    %138 = vector.shape_cast %137 : vector<1x1x16xf32> to vector<1x16xf32>
    %139 = vector.shape_cast %136 : vector<1x16xf32> to vector<1x1x16xf32>
    tpu.vector_store %arg7[%c0_61, %c0_62, %c0_63], %139 {strides = array<i32>} : memref<1x2x16xf32, #tpu.memory_space<vmem>>, vector<1x1x16xf32>,
    %cst_64 = arith.constant 1.000000e+00 : f32
    %140 = vector.broadcast %cst_64 : f32 to vector<1x16xf32>
    %141 = arith.subf %140, %136 : vector<1x16xf32>
    %c0_65 = arith.constant 0 : index
    %c1_66 = arith.constant 1 : index
    %c0_67 = arith.constant 0 : index
    %142 = vector.load %arg7[%c0_65, %c1_66, %c0_67] : memref<1x2x16xf32, #tpu.memory_space<vmem>>, vector<1x1x16xf32>
    %143 = vector.shape_cast %142 : vector<1x1x16xf32> to vector<1x16xf32>
    %144 = vector.shape_cast %141 : vector<1x16xf32> to vector<1x1x16xf32>
    tpu.vector_store %arg7[%c0_65, %c1_66, %c0_67], %144 {strides = array<i32>} : memref<1x2x16xf32, #tpu.memory_space<vmem>>, vector<1x1x16xf32>,
    return
  }
  func.func @transform_0(%arg0: i32) -> (i32, i32, i32) {
    %c0_i32 = arith.constant 0 : i32
    %c0_i32_0 = arith.constant 0 : i32
    %c0_i32_1 = arith.constant 0 : i32
    return %arg0, %c0_i32, %c0_i32_0 : i32, i32, i32
  }
  func.func @transform_1(%arg0: i32) -> (i32, i32, i32) {
    %c0_i32 = arith.constant 0 : i32
    %c0_i32_0 = arith.constant 0 : i32
    %c0_i32_1 = arith.constant 0 : i32
    return %arg0, %c0_i32, %c0_i32_0 : i32, i32, i32
  }
  func.func @transform_2(%arg0: i32) -> (i32, i32) {
    %c0_i32 = arith.constant 0 : i32
    %c0_i32_0 = arith.constant 0 : i32
    %c0_i32_1 = arith.constant 0 : i32
    return %c0_i32, %c0_i32_0 : i32, i32
  }
  func.func @transform_3(%arg0: i32) -> i32 {
    %c0_i32 = arith.constant 0 : i32
    %c0_i32_0 = arith.constant 0 : i32
    return %c0_i32 : i32
  }
  func.func @transform_4(%arg0: i32) -> (i32, i32) {
    %c0_i32 = arith.constant 0 : i32
    %c0_i32_0 = arith.constant 0 : i32
    %c0_i32_1 = arith.constant 0 : i32
    return %c0_i32, %c0_i32_0 : i32, i32
  }
  func.func @transform_5(%arg0: i32) -> i32 {
    %c0_i32 = arith.constant 0 : i32
    %c0_i32_0 = arith.constant 0 : i32
    return %c0_i32 : i32
  }
  func.func @transform_6(%arg0: i32) -> (i32, i32, i32) {
    %c0_i32 = arith.constant 0 : i32
    %c0_i32_0 = arith.constant 0 : i32
    %c0_i32_1 = arith.constant 0 : i32
    return %arg0, %c0_i32, %c0_i32_0 : i32, i32, i32
  }
}

</mosaic_0001>

<bundles_post_ra>
// kernel: tpu_custom_call.1
= control target key start
LH: loop header
LB: loop body
LE: loop exit
PB: predicated region body
PF: predicated region fallthrough
CT: control target
= control target key end

     0   :  { %s1376_s0 = inlined_call_operand.hbm [shape: f32[2,16,64], index: 0, kind: input, shape index: {}]   ;;  %s1377_s1 = inlined_call_operand.hbm [shape: f32[2,16,64], index: 1, kind: input, shape index: {}]   ;;  %s1378_s2 = inlined_call_operand.vmem [shape: f32[4,3], index: 2, kind: input, shape index: {}]   ;;  %s1379_s3 = inlined_call_operand.<no memory space> [shape: f32[1], index: 3, kind: input, shape index: {}]   ;;  %s1380_s4 = inlined_call_operand.hbm [shape: f32[4,3], index: 4, kind: input, shape index: {}]   ;;  %s1381_s5 = inlined_call_operand.<no memory space> [shape: f32[1], index: 5, kind: input, shape index: {}]   ;;  %s1382_s6 = inlined_call_operand.hbm [shape: f32[2,2,16], index: 6, kind: output, shape index: {}]  }
   0x1   :  { %1384 = sst [smem:[#allocation20_spill]] %s1378_s2 }
   0x2   :  { %1385 = sst [smem:[#allocation21_spill]] %s1380_s4 }
   0x3   :  { %11 = sst [smem:[#allocation2]] %s1379_s3 }
   0x4   :  { %12 = sst [smem:[#allocation3]] %s1381_s5 }
   0x5   :  { %13 = vsyncpa [#allocation5], 0 }
   0x6   :  { %15 = vsyncpa [#allocation5 + $0x1], 0 }
   0x7   :  { %16 = vsyncpa [#allocation10], 0 }
   0x8   :  { %18 = vsyncpa [#allocation10 + $0x1], 0 }
   0x9   :  { %19 = vsyncpa [#allocation8], 0 }
   0xa   :  { %20 = vsyncpa [#allocation7], 0 }
   0xb   :  { %21 = vsyncpa [#allocation6], 0 }
   0xc   :  { %23 = vsyncpa [#allocation6 + $0x1], 0  ;;  %s1081_s25 = smov 0   ;;  %s1083_s26 = smov 0  }
   0xd   :  { %s1085_s27 = smov 0   ;;  %s1087_s28 = smov 0  }
   0xe LB: > { %s1102_s3 = sadd.s32 4294967295, %s1032_s28   ;;  %s738_s5 = sadd.s32 4294967294, %s1032_s28   ;;  %s1032_s28 = sphi %s1087_s28, %s1401_s28   ;;  %s1028_s27 = sphi %s1085_s27, %s1400_s27   ;;  %s1024_s26 = sphi %s1083_s26, %s1399_s26   ;;  %s1020_s25 = sphi %s1081_s25, %s1398_s25  }
   0xf   : > { %s1106_s29 = sadd.s32 1, %s1032_s28   ;;  %s36_s30 = sadd.s32 1, %s1028_s27 }
  0x10   : > { %s33_s7 = ssub.s32 %s1032_s28, %s1106_s29  ;;  %p43_p0 = scmp.ne.s32.totalorder %s1028_s27, %s1024_s26 }
  0x11   : > { %p34_p1 = scmp.eq.s32.totalorder %s33_s7, 0  ;;  %p44_p2 = scmp.eq.s32.totalorder %s1032_s28, 0 }
  0x12   : > { %p49_p3 = scmp.ne.s32.totalorder %s1024_s26, %s1020_s25  ;;  %p50_p4 = scmp.eq.s32.totalorder %s1102_s3, 0 }
  0x13   : > { %s1118_s8 = scalar_select %p34_p1, %s1028_s27, %s36_s30  }
  0x14   : > { %p1120_p5 = por %p44_p2, %p43_p0  ;;  %p1126_p6 = por %p50_p4, %p49_p3 }
  0x15   : > { %1386 = sst [smem:[#allocation19_spill]] %s1118_s8  ;;  %p183_p7 = scmp.eq.s32.totalorder %s1102_s3, 1 }
  0x16   : > { %p189_p8 = scmp.eq.s32.totalorder %s738_s5, 1  ;;  %p739_p9 = scmp.ge.s32.totalorder %s1032_s28, 1 }
  0x17   : > { %p196_p10 = scmp.lt.s32.totalorder %s1032_s28, 3  ;;  %p1133_p11 = por %p183_p7, %p43_p0 }
  0x18   : > { %p1137_p12 = por %p189_p8, %p49_p3  ;;  %s1392_s2 = sld [smem:[#allocation20_spill]] }
  0x19   : > { %p1141_p13 = pnand %p739_p9, %p196_p10  ;;  %p818_p2 = scmp.lt.s32.totalorder %s1032_s28, 2 }
  0x1a   : > { %s1393_s4 = sld [smem:[#allocation21_spill]]  ;;  %s1034_s21 = smov [#allocation11]  }
  0x1b   : > { %p798_p1 = pneg %p1141_p13  ;;  %p1159_p7 = pnand %p818_p2, %p1120_p5 }
  0x1c   : > { %s1164_s22 = sand.u32 1, %s1028_s27   ;;  %s1035_s23 = smov [#allocation12]  }
  0x1d   : > { %p799_p3 = pnand %p798_p1, %p50_p4  ;;  %s1383_s24 = sshll.u32 %s1164_s22, 4 }
  0x1e   : > { %s208_s16 = sshll.u32 %s1392_s2, 4  ;;  %s782_s5 = sshll.u32 %s1032_s28, 4  ;;  %s209_s16 = int_to_ptr.vmem [resolvable:$true] %s208_s16 }
  0x1f   : > { %801 = dma.vmem_to_smem (!%p799_p3), %s209_s16, 64, %s1034_s21, [#allocation8]  }
  0x20   : > { %s221_s19 = sshll.u32 %s1393_s4, 4  ;;  %s244_s9 = scalar_lea.hbm %s1376_s0, %s782_s5  ;;  %s222_s19 = int_to_ptr.hbm [resolvable:$true] %s221_s19 }
  0x21   : > { %804 = dma.hbm_to_smem (!%p799_p3), %s222_s19, 64, %s1035_s23, [#allocation7]  }
  0x22   : > { %s239_s14 = scalar_lea.vmem [#allocation4], %s1383_s24  ;;  %s245_s17 = sshll.u32 %s244_s9, 4  ;;  %s246_s17 = int_to_ptr.hbm [resolvable:$true] %s245_s17 }
  0x23   : > { %s247_s15 = sshll.u32 %s239_s14, 4  ;;  %s236_s16 = scalar_lea.sflag [#allocation5], %s1164_s22  ;;  %s248_s15 = int_to_ptr.vmem [resolvable:$true] %s247_s15 }
  0x24   : > { %s894_s18 = sshra.s32 %s246_s17, 4  ;;  %p898_p8 = pneg %p1159_p7  ;;  %s895_s18 = int_to_ptr.hbm [resolvable:$true] %s894_s18 }
  0x25   : > { %s896_s21 = scalar_lea.hbm %s895_s18, 16  ;;  %s901_s30 = scalar_lea.hbm %s1376_s0, 32 }
  0x26   : > { %p897_p5 = scmp.ne.s32.totalorder %s895_s18, %s896_s21  ;;  %p902_p1 = scmp.lt.s32.totalorder %s895_s18, %s1376_s0 }
  0x27   : > { %p903_p2 = scmp.lt.s32.totalorder %s901_s30, %s896_s21 }
  0x28   : > { %p899_p9 = pnand %p898_p8, %p897_p5 }
  0x29   : > { %p904_p3 = por %p903_p2, %p902_p1 }
  0x2a   : > { %p900_p10 = pneg %p899_p9 }
  0x2c   : > { %p905_p0 = pnand %p904_p3, %p900_p10 }
  0x2e   : > { %908 = shalt.err (!%p905_p0)
}
  0x2f   : > { %s1036_s9 = smov 128   ;;  %s1037_s24 = smov 8  }
  0x30   : > { %808 = dma.hbm_to_vmem [thread:$0]  (!%p1159_p7), %s246_s17, 256, %s248_s15, %s236_s16, %s1036_s9, %s1036_s9, %s1037_s24  }
  0x31   : > { %s266_s19 = scalar_lea.hbm %s1377_s1, %s782_s5  ;;  %s1395_s8 = sshll.u32 %s1164_s22, 4 }
  0x32   : > { %s267_s23 = sshll.u32 %s266_s19, 4  ;;  %s261_s7 = scalar_lea.vmem [#allocation9], %s1395_s8  ;;  %s268_s23 = int_to_ptr.hbm [resolvable:$true] %s267_s23 }
  0x33   : > { %s269_s18 = sshll.u32 %s261_s7, 4  ;;  %s258_s21 = scalar_lea.sflag [#allocation10], %s1164_s22  ;;  %s270_s18 = int_to_ptr.vmem [resolvable:$true] %s269_s18 }
  0x34   : > { %s924_s30 = sshra.s32 %s268_s23, 4  ;;  %s931_s2 = scalar_lea.hbm %s1377_s1, 32  ;;  %s925_s30 = int_to_ptr.hbm [resolvable:$true] %s924_s30 }
  0x35   : > { %s926_s14 = scalar_lea.hbm %s925_s30, 16  ;;  %p932_p10 = scmp.lt.s32.totalorder %s925_s30, %s1377_s1 }
  0x36   : > { %p927_p0 = scmp.ne.s32.totalorder %s925_s30, %s926_s14  ;;  %p933_p1 = scmp.lt.s32.totalorder %s931_s2, %s926_s14 }
  0x38   : > { %p929_p5 = pnand %p927_p0, %p898_p8  ;;  %p934_p2 = por %p933_p1, %p932_p10 }
  0x3a   : > { %p930_p9 = pneg %p929_p5 }
  0x3c   : > { %p935_p3 = pnand %p934_p2, %p930_p9 }
  0x3e   : > { %938 = shalt.err (!%p935_p3)
}
  0x3f   : > { %811 = dma.hbm_to_vmem [thread:$0]  (!%p1159_p7), %s268_s23, 256, %s270_s18, %s258_s21, %s1036_s9, %s1036_s9, %s1037_s24  }
  0x40   : > { %281 = sbr.rel (%p1141_p13) target bundleno = 405 (0x195), region = 44  ;;  %s1207_s8 = sand.u32 (!%p1141_p13), 1, %s1024_s26  }
  0x41   : > { %s750_s22 = sshll.u32 (!%p1141_p13), %s1207_s8, 4  ;;  %s284_s16 = scalar_lea.sflag (!%p1141_p13), [#allocation5], %s1207_s8 }
  0x42   : > { %s287_s19 = scalar_lea.vmem (!%p1141_p13), [#allocation4], %s750_s22 }
  0x45   : > { %999 = dma.done.wait (%p1126_p6), %s284_s16, 256  }
  0x46   : > { %1001 = vsyncadd (%p1126_p6), %s284_s16, 4294967040  ;;  %s294_s20 = scalar_lea.sflag [#allocation10], %s1207_s8  ;;  %s297_s24 = scalar_lea.vmem [#allocation9], %s750_s22 }
  0x47   : > { %1003 = dma.done.wait (%p1126_p6), %s294_s20, 256  }
  0x48   : > { %1005 = vsyncadd (%p1126_p6), %s294_s20, 4294967040 }
  0x49   : > { %1007 = dma.done.wait (%p50_p4), [#allocation8], 64  }
  0x4a   : > { %1009 = vsyncadd (%p50_p4), [#allocation8], 4294967232 }
  0x4b   : > { %1011 = dma.done.wait (%p50_p4), [#allocation7], 64  }
  0x4c   : > { %1013 = vsyncadd (%p50_p4), [#allocation7], 4294967232 }
  0x4d   : > { %313 = sfence }
  0x4e   : > { %v343_v0 = vld [vmem:[%s287_s19] sm:$0xff]  ;;  %vm347_vm0 = vcmask 523264   ;;  %v344_v5 = vld [vmem:[%s287_s19 + $0x8] sm:$0xff]  ;;  %v378_v12 = vlaneseq  ;;  %s1236_s10 = sld [smem:[#allocation12 + $0x81]]  ;;  %vm384_vm1 = vcmask 138312   ;;  %vm387_vm2 = vcmask 7168  }
  0x4f   : > { %v345_v1 = vld [vmem:[%s297_s24] sm:$0xff]  ;;  %v356_v2 = vsel %vm347_vm0, %v343_v0, -inf  ;;  %v348_v3 = vsel %vm347_vm0, %v343_v0, 0.0  ;;  %v346_v6 = vld [vmem:[%s297_s24 + $0x8] sm:$0xff]  ;;  %v359_v7 = vsel %vm347_vm0, %v344_v5, -inf  ;;  %v351_v8 = vsel %vm347_vm0, %v344_v5, 0.0 }
  0x50   : > { %v362_v4 = vsel %vm347_vm0, %v345_v1, 0.0  ;;  %357 = vmax.xlane.f32.xlu1 %v356_v2  ;;  %349 = vadd.xlane.f32.xlu0 %v348_v3  ;;  %v365_v9 = vsel %vm347_vm0, %v346_v6, 0.0  ;;  %v373_v10 = vsel %vm347_vm0, %v346_v6, -inf  ;;  %v370_v11 = vsel %vm347_vm0, %v345_v1, -inf  ;;  %s1238_s13 = sld [smem:[#allocation11 + $0x81]]  ;;  %s1038_s16 = smov 127  }
  0x51   : > { %363 = vadd.xlane.f32.xlu2 %v362_v4  ;;  %s1240_s9 = sld [smem:[#allocation12 + $0x82]]  ;;  %v379_v15 = vand.u32 127, %v378_v12  ;;  %vm389_vm3 = vcmask 138240   ;;  %vm601_vm7 = vcmask 122880  }
  0x52   : > { %s1242_s23 = sld [smem:[#allocation12 + $0x181]] }
  0x53   : > { %s1244_s7 = sld [smem:[#allocation11 + $0x181]]  ;;  %v380_v17 = vadd.s32 4294967295, %v379_v15  ;;  %v382_v18 = vadd.s32 4294967287, %v379_v15 }
  0x54   : > { %s1246_s18 = sld [smem:[#allocation2]]  ;;  %v478_v29 = vstv %s1236_s10  ;;  %s1039_s10 = smov 126  }
  0x55   : > { %s1248_s21 = sld [smem:[#allocation11]] }
  0x56   : > { %s1250_s30 = sld [smem:[#allocation11 + $0x80]]  ;;  %v470_v33 = vstv %s1238_s13 }
  0x57   : > { %s1252_s14 = sld [smem:[#allocation11 + $0x100]]  ;;  %v542_v38 = vstv %s1240_s9 }
  0x58   : > { %360 = vmax.xlane.f32.xlu1 %v359_v7  ;;  %352 = vadd.xlane.f32.xlu0 %v351_v8  ;;  %s1254_s15 = sld [smem:[#allocation3]]  ;;  %v510_v57 = vstv %s1242_s23 }
  0x59   : > { %366 = vadd.xlane.f32.xlu2 %v365_v9  ;;  %s1256_s17 = sld [smem:[#allocation12 + $0x80]]  ;;  %v502_v58 = vstv %s1244_s7 }
  0x5a   : > { %s1258_s2 = sld [smem:[#allocation12]]  ;;  %v416_v45 = vstv %s1246_s18 }
  0x5b   : > { %s1260_s4 = sld [smem:[#allocation11 + $0x180]]  ;;  %v422_v46 = vstv %s1248_s21 }
  0x5c   : > { %s1263_s5 = sld [smem:[#allocation12 + $0x100]]  ;;  %v430_v39 = vstv %s1250_s30 }
  0x5d   : > { %s1267_s22 = sld [smem:[#allocation12 + $0x180]]  ;;  %v438_v56 = vstv %s1252_s14 }
  0x5e   : > { %v419_v51 = vstv %s1254_s15  ;;  %s1297_s19 = sld [smem:[#allocation11 + $0x1]]  ;;  %s754_s15 = sshll.u32 %s1207_s8, 1 }
  0x5f   : > { %v434_v47 = vstv %s1256_s17  ;;  %s1302_s20 = sld [smem:[#allocation11 + $0x82]]  ;;  %s779_s17 = sshll.u32 %s1102_s3, 1 }
  0x60   : > { %374 = vmax.xlane.f32.xlu1 %v373_v10  ;;  %371 = vmax.xlane.f32.xlu0 %v370_v11  ;;  %v426_v52 = vstv %s1258_s2  ;;  %s1308_s24 = sld [smem:[#allocation12 + $0x2]]  ;;  %s606_s3 = scalar_lea.sflag [#allocation6], %s1207_s8 }
  0x61   : > { %v446_v59 = vstv %s1260_s4  ;;  %s766_s13 = sld [smem:[#allocation12 + $0x101]] }
  0x62   : > { %v442_v60 = vstv %s1263_s5  ;;  %s773_s9 = sld [smem:[#allocation11 + $0x102]]  ;;  %s616_s5 = scalar_lea.hbm %s1382_s6, %s779_s17 }
  0x63   : > { %v450_v0 = vstv %s1267_s22  ;;  %s762_s23 = sld [smem:[#allocation12 + $0x1]]  ;;  %s342_s22 = scalar_lea.vmem [#allocation13], %s754_s15 }
  0x64   : > { %s769_s7 = sld [smem:[#allocation11 + $0x2]] }
  0x65   : > { %s765_s18 = sld [smem:[#allocation11 + $0x101]] }
  0x66   : > { %s776_s21 = sld [smem:[#allocation12 + $0x182]] }
  0x67   : > { %s775_s30 = sld [smem:[#allocation11 + $0x182]] }
  0x68   : > { %s774_s14 = sld [smem:[#allocation12 + $0x102]] }
  0xc3   : > { %v358_v13 = vpop.xlane.xlu1 %357  ;;  %v350_v14 = vpop.xlane.xlu0 %349 }
  0xc4   : > { %v364_v16 = vpop.xlane.xlu2 %363  ;;  %v354_v20 = vmul.f32 0.015625, %v350_v14  ;;  %v393_v23 = vperm.slane %v358_v13, %v380_v17 }
  0xc5   : > { %v368_v19 = vmul.f32 0.015625, %v364_v16 }
  0xc6   : > { %v381_v30 = vperm.slane %v354_v20, %v380_v17 }
  0xc7   : > { %v401_v27 = vperm.slane %v368_v19, %v380_v17  ;;  %v534_v19 = vstv %s1302_s20 }
  0xcb   : > { %v361_v21 = vpop.xlane.xlu1 %360  ;;  %v353_v22 = vpop.xlane.xlu0 %352 }
  0xcc   : > { %v394_v24 = vperm.slane %v361_v21, %v382_v18  ;;  %v355_v25 = vmul.f32 0.015625, %v353_v22  ;;  %v367_v26 = vpop.xlane.xlu2 %366  ;;  %v526_v22 = vstv %s1308_s24 }
  0xcd   : > { %v369_v28 = vmul.f32 0.015625, %v367_v26  ;;  %v494_v26 = vstv %s766_s13 }
  0xce   : > { %v395_v31 = vsel %vm384_vm1, %v394_v24, %v393_v23  ;;  %v383_v32 = vperm.slane %v355_v25, %v382_v18 }
  0xcf   : > { %v397_v34 = vsel %vm387_vm2, 0.0, %v395_v31  ;;  %v402_v35 = vperm.slane %v369_v28, %v382_v18  ;;  %v462_v28 = vstv %s762_s23 }
  0xd0   : > { %v1271_v36 = vsel %vm389_vm3, %v397_v34, 0.0  ;;  %v385_v37 = vsel %vm384_vm1, %v383_v32, %v381_v30  ;;  %v518_v32 = vstv %s769_s7  ;;  %v574_v34 = vstv %s776_s21 }
  0xd1   : > { %v388_v40 = vsel %vm387_vm2, 0.0, %v385_v37  ;;  %v403_v41 = vsel %vm384_vm1, %v402_v35, %v401_v27  ;;  %v479_v42 = vmul.f32 %v478_v29, %v1271_v36  ;;  %v471_v43 = vmul.f32 %v470_v33, %v1271_v36 }
  0xd2   : > { %v405_v44 = vsel %vm387_vm2, 0.0, %v403_v41  ;;  %v1285_v48 = vsel %vm389_vm3, %v388_v40, 0.0  ;;  %v431_v2 = vmul.f32 %v430_v39, %v1271_v36  ;;  %v435_v4 = vmul.f32 %v434_v47, %v1271_v36 }
  0xd3   : > { %481 = vrot.lane.b32.xlu2 %v479_v42, %s1038_s16  ;;  %473 = vrot.lane.b32.xlu1 %v471_v43, %s1038_s16  ;;  %v375_v49 = vpop.xlane.xlu1 %374  ;;  %v372_v50 = vpop.xlane.xlu0 %371  ;;  %v1292_v53 = vsel %vm389_vm3, %v405_v44, 0.0  ;;  %v423_v62 = vmul.f32 %v422_v46, %v1285_v48  ;;  %v427_v63 = vmul.f32 %v426_v52, %v1285_v48  ;;  %v543_v9 = vmul.f32 %v542_v38, %v1271_v36 }
  0xd4   : > { %v410_v54 = vperm.slane %v375_v49, %v382_v18  ;;  %v409_v55 = vperm.slane %v372_v50, %v380_v17  ;;  %v439_v3 = vmul.f32 %v438_v56, %v1292_v53  ;;  %v443_v8 = vmul.f32 %v442_v60, %v1292_v53 }
  0xd5   : > { %v424_v6 = vadd.f32 %v423_v62, %v416_v45  ;;  %v428_v7 = vadd.f32 %v427_v63, %v419_v51  ;;  %v454_v18 = vstv %s1297_s19  ;;  %v535_v24 = vmul.f32 %v534_v19, %v1271_v36  ;;  %s620_s19 = sshll.u32 %s616_s5, 4  ;;  %s621_s19 = int_to_ptr.hbm [resolvable:$true] %s620_s19 }
  0xd6   : > { %v411_v61 = vsel %vm384_vm1, %v410_v54, %v409_v55  ;;  %v455_v23 = vmul.f32 %v454_v18, %v1285_v48  ;;  %v527_v25 = vmul.f32 %v526_v22, %v1285_v48  ;;  %v550_v27 = vstv %s773_s9  ;;  %s968_s20 = sshra.s32 %s621_s19, 4  ;;  %s974_s9 = scalar_lea.hbm %s1382_s6, 4  ;;  %s969_s20 = int_to_ptr.hbm [resolvable:$true] %s968_s20 }
  0xd7   : > { %v413_v1 = vsel %vm387_vm2, 0.0, %v411_v61  ;;  %v432_v12 = vadd.f32 %v431_v2, %v424_v6  ;;  %v436_v14 = vadd.f32 %v435_v4, %v428_v7  ;;  %v495_v29 = vmul.f32 %v494_v26, %v1292_v53  ;;  %s970_s24 = scalar_lea.hbm %s969_s20, 2  ;;  %p975_p7 = scmp.lt.s32.totalorder %s969_s20, %s1382_s6 }
  0xd8   : > { %v414_v5 = vsel %vm389_vm3, %v413_v1, 0.0  ;;  %v551_v30 = vmul.f32 %v550_v27, %v1292_v53  ;;  %v463_v31 = vmul.f32 %v462_v28, %v1285_v48  ;;  %v486_v33 = vstv %s765_s18  ;;  %p971_p4 = scmp.ne.s32.totalorder %s969_s20, %s970_s24  ;;  %p976_p8 = scmp.lt.s32.totalorder %s974_s9, %s970_s24 }
  0xd9   : > { %v511_v10 = vmul.f32 %v510_v57, %v414_v5  ;;  %v503_v11 = vmul.f32 %v502_v58, %v414_v5  ;;  %v447_v13 = vmul.f32 %v446_v59, %v414_v5  ;;  %v451_v15 = vmul.f32 %v450_v0, %v414_v5 }
  0xda   : > { %v440_v16 = vadd.f32 %v439_v3, %v432_v12  ;;  %v444_v17 = vadd.f32 %v443_v8, %v436_v14  ;;  %v519_v35 = vmul.f32 %v518_v32, %v1285_v48  ;;  %v487_v36 = vmul.f32 %v486_v33, %v1292_v53  ;;  %p972_p6 = pnand %p971_p4, %p1133_p11  ;;  %p977_p0 = por %p976_p8, %p975_p7 }
  0xdb   : > { %545 = vrot.lane.b32.xlu2 %v543_v9, %s1039_s10  ;;  %513 = vrot.lane.b32.xlu0 %v511_v10, %s1038_s16  ;;  %v575_v37 = vmul.f32 %v574_v34, %v414_v5  ;;  %v566_v38 = vstv %s775_s30  ;;  %v558_v39 = vstv %s774_s14 }
  0xdc   : > { %505 = vrot.lane.b32.xlu1 %v503_v11, %s1038_s16  ;;  %v448_v20 = vadd.f32 %v447_v13, %v440_v16  ;;  %v452_v21 = vadd.f32 %v451_v15, %v444_v17  ;;  %v567_v40 = vmul.f32 %v566_v38, %v414_v5  ;;  %v559_v41 = vmul.f32 %v558_v39, %v1292_v53  ;;  %p973_p13 = pneg %p972_p6 }
  0xde   : > { %p978_p5 = pnand %p977_p0, %p973_p13 }
  0xe3   : > { %457 = vrot.lane.b32.xlu2 %v455_v23, %s1038_s16  ;;  %537 = vrot.lane.b32.xlu0 %v535_v24, %s1039_s10 }
  0xe4   : > { %529 = vrot.lane.b32.xlu1 %v527_v25, %s1039_s10 }
  0xeb   : > { %497 = vrot.lane.b32.xlu2 %v495_v29, %s1038_s16  ;;  %465 = vrot.lane.b32.xlu0 %v463_v31, %s1038_s16 }
  0xec   : > { %553 = vrot.lane.b32.xlu1 %v551_v30, %s1039_s10 }
  0xf3   : > { %521 = vrot.lane.b32.xlu2 %v519_v35, %s1039_s10  ;;  %489 = vrot.lane.b32.xlu0 %v487_v36, %s1038_s16  ;;  %s618_s16 = sshll.u32 %s342_s22, 4  ;;  %s619_s16 = int_to_ptr.vmem [resolvable:$true] %s618_s16 }
  0xf4   : > { %577 = vrot.lane.b32.xlu1 %v575_v37, %s1039_s10 }
  0xfb   : > { %569 = vrot.lane.b32.xlu2 %v567_v40, %s1039_s10  ;;  %561 = vrot.lane.b32.xlu0 %v559_v41, %s1039_s10 }
 0x12d   : > { %v482_v42 = vpop.permute.xlu2 %481 }
 0x135   : > { %v546_v43 = vpop.permute.xlu2 %545 }
 0x13d   : > { %v458_v46 = vpop.permute.xlu2 %457 }
 0x13e   : > { %v460_v55 = vadd.f32 %v458_v46, %v448_v20 }
 0x145   : > { %v474_v44 = vpop.permute.xlu1 %473  ;;  %v498_v49 = vpop.permute.xlu2 %497 }
 0x146   : > { %v476_v57 = vadd.f32 %v474_v44, %v460_v55 }
 0x14d   : > { %v514_v45 = vpop.permute.xlu0 %513  ;;  %v522_v53 = vpop.permute.xlu2 %521 }
 0x14e   : > { %v506_v47 = vpop.permute.xlu1 %505 }
 0x155   : > { %v538_v48 = vpop.permute.xlu0 %537  ;;  %v570_v6 = vpop.permute.xlu2 %569 }
 0x156   : > { %v530_v50 = vpop.permute.xlu1 %529 }
 0x15d   : > { %v466_v51 = vpop.permute.xlu0 %465 }
 0x15e   : > { %v468_v52 = vadd.f32 %v466_v51, %v452_v21  ;;  %v554_v59 = vpop.permute.xlu1 %553 }
 0x160   : > { %v484_v54 = vadd.f32 %v482_v42, %v468_v52 }
 0x162   : > { %v500_v56 = vadd.f32 %v498_v49, %v484_v54 }
 0x164   : > { %v516_v58 = vadd.f32 %v514_v45, %v500_v56 }
 0x165   : > { %v490_v60 = vpop.permute.xlu0 %489 }
 0x166   : > { %v492_v61 = vadd.f32 %v490_v60, %v476_v57  ;;  %v532_v63 = vadd.f32 %v530_v50, %v516_v58  ;;  %v578_v7 = vpop.permute.xlu1 %577 }
 0x168   : > { %v508_v62 = vadd.f32 %v506_v47, %v492_v61  ;;  %v548_v2 = vadd.f32 %v546_v43, %v532_v63 }
 0x16a   : > { %v524_v0 = vadd.f32 %v522_v53, %v508_v62 }
 0x16c   : > { %v540_v1 = vadd.f32 %v538_v48, %v524_v0 }
 0x16d   : > { %v562_v3 = vpop.permute.xlu0 %561 }
 0x16e   : > { %v556_v4 = vadd.f32 %v554_v59, %v540_v1  ;;  %v564_v5 = vadd.f32 %v562_v3, %v548_v2 }
 0x170   : > { %v572_v8 = vadd.f32 %v570_v6, %v556_v4  ;;  %v580_v9 = vadd.f32 %v578_v7, %v564_v5 }
 0x172   : > { %v581_v10 = vsub.f32 %v572_v8, %v580_v9 }
 0x174   : > { %v777_v11 = vmul.f32 -1.442695, %v581_v10 }
 0x176   : > { %860 = vpow2.f32 %v777_v11 }
 0x17c   : > { %v861_v12 = vpop.eup %860 }
 0x17d   : > { %v585_v13 = vadd.f32 1.0, %v861_v12 }
 0x17f   : > { %862 = vrcp.f32 %v585_v13  ;;  %v597_v17 = vand.u32 2147483648, %v585_v13  ;;  %v595_v19 = vand.u32 2147483647, %v585_v13  ;;  %vm591_vm5 = vweird.f32 %v585_v13 }
 0x181   : > { %v598_v21 = vor.u32 1.1754944e-38, %v597_v17  ;;  %vm596_vm8 = vcmp.eq.f32.partialorder %v595_v19, 8.507059e+37 }
 0x185   : > { %v863_v14 = vpop.eup %862 }
 0x186   : > { %v587_v15 = vmul.f32 %v863_v14, %v585_v13  ;;  %vm592_vm4 = vweird.f32 %v863_v14 }
 0x187   : > { %vm593_vm6 = vmor %vm591_vm5, %vm592_vm4 }
 0x188   : > { %v588_v16 = vsub.f32 1.0, %v587_v15 }
 0x18a   : > { %v589_v18 = vmul.f32 %v863_v14, %v588_v16 }
 0x18c   : > { %v590_v20 = vadd.f32 %v863_v14, %v589_v18 }
 0x18e   : > { %v594_v22 = vsel %vm593_vm6, %v863_v14, %v590_v20 }
 0x18f   : > { %v599_v23 = vsel %vm596_vm8, %v598_v21, %v594_v22 }
 0x190   : > { %602 = vst.msk [vmem:[%s342_s22] sm:$0x1] %vm601_vm7, %v599_v23  ;;  %v603_v24 = vsub.f32 1.0, %v599_v23 }
 0x192   : > { %604 = vst.msk [vmem:[%s342_s22 + $0x1] sm:$0x1] %vm601_vm7, %v603_v24 }
 0x193   : > { %981 = shalt.err (!%p978_p5)
}
 0x194   : > { %796 = dma.vmem_to_hbm [thread:$0]  (%p1133_p11), %s619_s16, 32, %s621_s19, %s606_s3  }
 0x195 PF: > { %s632_s8 = sand.u32 1, %s1020_s25   ;;  %p1396_p9 = scmp.ge.s32.totalorder %s1032_s28, 2 }
 0x196   : > { %s633_s18 = scalar_lea.sflag [#allocation6], %s632_s8 }
 0x197   : > { %p813_p10 = pnand %p1396_p9, %p1137_p12 }
 0x199   : > { %p814_p1 = pneg %p813_p10 }
 0x19b   : > { %1015 = dma.done.wait (%p814_p1), %s633_s18, 32  }
 0x19c   : > { %1017 = vsyncadd (%p814_p1), %s633_s18, 4294967264  ;;  %s1397_s21 = sld [smem:[#allocation19_spill]]  ;;  %p26_p2 = scmp.ge.s32.totalorder %s1106_s29, 4  }
 0x19d   : > { %s1398_s25 = smov %s1024_s26  ;;  %s1399_s26 = smov %s1028_s27 }
 0x19e   : > { %s1401_s28 = smov %s1106_s29  ;;  %28 = sbr.rel (!%p26_p2) target bundleno = 14 (0xe), region = 112 }
 0x1a2   : > { %s1400_s27 = smov %s1397_s21 }
 0x1a3   :  { %639 = vsyncpa [#allocation5], 1 }
 0x1a4   :  { %641 = vsyncpa [#allocation5 + $0x1], 1 }
 0x1a5   :  { %642 = vsyncpa [#allocation10], 1 }
 0x1a6   :  { %644 = vsyncpa [#allocation10 + $0x1], 1 }
 0x1a7   :  { %645 = vsyncpa [#allocation6], 1 }
 0x1a8   :  { %647 = vsyncpa [#allocation6 + $0x1], 1 }
 0x1a9   :  { %648 = vsyncpa [#allocation7], 1 }
 0x1aa   :  { %650 = vsyncpa [#allocation7 + $0x1], 1 }
 0x1ab   :  { %651 = vsyncpa [#allocation8], 1 }
 0x1ac   :  { %653 = vsyncpa [#allocation8 + $0x1], 1 }

</bundles_post_ra>
